<compile_context>
chip_gen: v7x
topology: tpu7x:2x2x1
jax: 0.10.0
libtpu: 0.0.40
codegen_flags: <defaults>
</compile_context>

<pallas_src>
import jax
import jax.numpy as jnp
import numpy as np
from jax.experimental import pallas as pl
from jax.experimental.pallas import tpu as pltpu


def _round_up(v, m):
    return ((v + m - 1) // m) * m


def _pick_tile(n_pad, preferred):
    """Largest multiple of 128 that divides n_pad, capped at `preferred`."""
    t = max(128, min(preferred, n_pad))
    t = (t // 128) * 128
    while n_pad % t != 0:
        t -= 128
    return t


# --------------------------------------------------------------------------- #
# Kernels: pure adj @ support stream with a resident f32 accumulator.
# --------------------------------------------------------------------------- #
def _gcn_kernel(adj_ref, s_ref, o_ref, acc_ref):
    k = pl.program_id(1)

    @pl.when(k == 0)
    def _init():
        acc_ref[...] = jnp.zeros_like(acc_ref)

    # acc += adj[i*TM:(i+1)*TM, k*TK:(k+1)*TK] @ support[k*TK:(k+1)*TK, :]
    acc_ref[...] += jnp.dot(adj_ref[...], s_ref[...],
                            preferred_element_type=jnp.float32)

    @pl.when(k == pl.num_programs(1) - 1)
    def _fin():
        # ReLU; dropout(p=0.0) / eval mode is the identity.
        # TODO(synk): training-mode dropout p>0 would need pltpu.prng_seed +
        # pltpu.prng_random_bits masking here.
        o_ref[...] = jnp.maximum(acc_ref[...], 0.0).astype(o_ref.dtype)


def _gcn_kernel_bias(adj_ref, s_ref, b_ref, o_ref, acc_ref):
    k = pl.program_id(1)

    @pl.when(k == 0)
    def _init():
        acc_ref[...] = jnp.zeros_like(acc_ref)

    acc_ref[...] += jnp.dot(adj_ref[...], s_ref[...],
                            preferred_element_type=jnp.float32)

    @pl.when(k == pl.num_programs(1) - 1)
    def _fin():
        out = acc_ref[...] + b_ref[...].astype(jnp.float32)
        o_ref[...] = jnp.maximum(out, 0.0).astype(o_ref.dtype)


# --------------------------------------------------------------------------- #
# Wrapper
# --------------------------------------------------------------------------- #
def prepare_adjacency(adj, *, compute_dtype=jnp.bfloat16):
    """Pad adj to a multiple of 128 and cast once; reuse across layers/calls."""
    n = adj.shape[0]
    assert adj.shape == (n, n)
    n_pad = _round_up(n, 128)
    return jnp.pad(adj.astype(jnp.dtype(compute_dtype)),
                   ((0, n_pad - n), (0, n_pad - n)))


def graph_convolution(x, adj, weight, bias=None, *,
                      adj_prepared=None,
                      compute_dtype=jnp.bfloat16,
                      out_dtype=jnp.bfloat16,
                      tile_m=512, tile_k=512):
    """x: [N, inDim], adj: [N, N], weight: [inDim, outDim], bias: [outDim]|None.

    If `adj_prepared` (output of prepare_adjacency) is given, the per-call adj
    pad/cast pass is skipped entirely.
    """
    n, in_dim = x.shape
    out_dim = weight.shape[1]
    assert weight.shape[0] == in_dim and adj.shape == (n, n)

    cd = jnp.dtype(compute_dtype)
    n_pad = _round_up(n, 128)          # node axis, (8,128)-aligned
    out_p = _round_up(out_dim, 128)    # lane-dense output stores

    tm = _pick_tile(n_pad, tile_m)
    tk = _pick_tile(n_pad, tile_k)
    grid = (n_pad // tm, n_pad // tk)

    # adj stream (dominant N^2 traffic): prepared once if caller provides it.
    if adj_prepared is not None:
        adj_p = adj_prepared
        assert adj_p.shape == (n_pad, n_pad) and adj_p.dtype == cd
    else:
        adj_p = prepare_adjacency(adj, compute_dtype=cd)

    # Precompute support = x @ W once, in f32 (single rounding to bf16 after),
    # pad node rows and lane-pad the feature dim.
    support = jnp.dot(x.astype(jnp.float32), weight.astype(jnp.float32),
                      preferred_element_type=jnp.float32)
    support_p = jnp.pad(support, ((0, n_pad - n), (0, out_p - out_dim))).astype(cd)

    in_specs = [
        pl.BlockSpec((tm, tk), lambda i, k: (i, k)),        # adj tile
        pl.BlockSpec((tk, out_p), lambda i, k: (k, 0)),     # support tile
    ]
    operands = [adj_p, support_p]
    kernel = _gcn_kernel
    if bias is not None:
        b_p = jnp.pad(bias.astype(jnp.float32).reshape(1, out_dim),
                      ((0, 0), (0, out_p - out_dim)))
        in_specs.append(pl.BlockSpec((1, out_p), lambda i, k: (0, 0)))
        operands.append(b_p)
        kernel = _gcn_kernel_bias

    out_dt = jnp.dtype(out_dtype)
    cost = pl.CostEstimate(
        flops=2 * n_pad * n_pad * out_p,
        transcendentals=0,
        bytes_accessed=(n_pad * n_pad * cd.itemsize          # adj stream
                        + n_pad * out_p * cd.itemsize        # support stream
                        + n_pad * out_p * out_dt.itemsize),  # output writeback
    )

    out_full = pl.pallas_call(
        kernel,
        out_shape=jax.ShapeDtypeStruct((n_pad, out_p), out_dt),
        grid_spec=pltpu.PrefetchScalarGridSpec(
            num_scalar_prefetch=0,
            grid=grid,                                        # (rows, reduction)
            in_specs=in_specs,
            out_specs=pl.BlockSpec((tm, out_p), lambda i, k: (i, 0)),
            scratch_shapes=[pltpu.VMEM((tm, out_p), jnp.float32)],
        ),
        compiler_params=pltpu.CompilerParams(
            # row axis parallel (v7x megacore splits grid[0] across its 2 TCs),
            # reduction axis arbitrary (output block constant over k).
            dimension_semantics=("parallel", "arbitrary"),
            # VMEM per step: adj 2*tm*tk*2 B + support 2*tk*out_p*2 B
            # + acc tm*out_p*4 B + out 2*tm*out_p*2 B  ->  ~1.5 MiB at 512 tiles,
            # well under default scoped limits on v5e/v6e/v7x.  Raise
            # vmem_limit_bytes if tm/tk are pushed to 1024-2048 on v6e.
        ),
        cost_estimate=cost,
    )(*operands)

    return out_full[:n, :out_dim]


class GraphConvolution:
    """JAX/Pallas port of the PyTorch GraphConvolution module (inference)."""

    def __init__(self, inDim, outDim, bias=False, dropout=0.0, key=None):
        if key is None:
            key = jax.random.PRNGKey(0)
        stdv = np.sqrt(6.0 / (inDim + outDim))
        self.weight = jax.random.uniform(
            key, (inDim, outDim), dtype=jnp.float32, minval=-stdv, maxval=stdv)
        self.bias = jnp.zeros((outDim,), dtype=jnp.float32) if bias else None
        self.dropout = dropout  # eval-mode / p=0.0 -> identity

    def __call__(self, x, adj, adj_prepared=None, tile_m=512, tile_k=512):
        return graph_convolution(x, adj, self.weight, self.bias,
                                 adj_prepared=adj_prepared,
                                 tile_m=tile_m, tile_k=tile_k)


def _reference(x, adj, weight, bias):
    """Plain-JAX reference with the same bf16 adj/support + f32 accumulation."""
    support = jnp.dot(x.astype(jnp.float32), weight.astype(jnp.float32))
    out = jnp.dot(adj.astype(jnp.bfloat16), support.astype(jnp.bfloat16),
                  preferred_element_type=jnp.float32)
    if bias is not None:
        out = out + bias
    return jnp.maximum(out, 0.0)


if __name__ == "__main__":
    key = jax.random.PRNGKey(0)
    k_x, k_adj, k_w = jax.random.split(key, 3)

    N, IN_DIM, OUT_DIM = 256, 32, 64
    x = jax.random.normal(k_x, (N, IN_DIM), dtype=jnp.float32)
    # symmetric, row-normalized adjacency (deterministic)
    a = jax.random.uniform(k_adj, (N, N), dtype=jnp.float32)
    adj = (a + a.T) * 0.5
    adj = adj / jnp.sum(adj, axis=1, keepdims=True)

    # Prepare (pad + bf16-cast) the adjacency ONCE and reuse it across layers.
    adj_prep = prepare_adjacency(adj)

    # --- no-bias variant (module default), tiles -> real 2x2 grid ------------
    layer = GraphConvolution(IN_DIM, OUT_DIM, bias=False, dropout=0.0, key=k_w)
    out = jax.block_until_ready(
        layer(x, adj, adj_prepared=adj_prep, tile_m=128, tile_k=128))
    ref = _reference(x, adj, layer.weight, None)
    np.testing.assert_allclose(np.asarray(out, dtype=np.float32),
                               np.asarray(ref), rtol=2e-2, atol=2e-2)

    # --- bias variant, reusing the same prepared adj, larger tiles -----------
    layer_b = GraphConvolution(IN_DIM, OUT_DIM, bias=True, dropout=0.0, key=k_w)
    out_b = jax.block_until_ready(
        layer_b(x, adj, adj_prepared=adj_prep, tile_m=256, tile_k=256))
    ref_b = _reference(x, adj, layer_b.weight, layer_b.bias)
    np.testing.assert_allclose(np.asarray(out_b, dtype=np.float32),
                               np.asarray(ref_b), rtol=2e-2, atol=2e-2)

    # --- path without a prepared adj (wrapper pads/casts internally) ---------
    out_c = jax.block_until_ready(layer(x, adj, tile_m=128, tile_k=128))
    np.testing.assert_allclose(np.asarray(out_c, dtype=np.float32),
                               np.asarray(ref), rtol=2e-2, atol=2e-2)

    print("KERNEL_OK")
</pallas_src>

<mosaic_0001>
module attributes {stable_mosaic.version = 11 : i64} {
  func.func @_gcn_kernel(%arg0: i32, %arg1: i32, %arg2: memref<128x128xbf16, #tpu.memory_space<vmem>>, %arg3: memref<128x128xbf16, #tpu.memory_space<vmem>>, %arg4: memref<128x128xbf16, #tpu.memory_space<vmem>>, %arg5: memref<128x128xf32, #tpu.memory_space<vmem>>) attributes {dimension_semantics = [#tpu.dimension_semantics<parallel>, #tpu.dimension_semantics<arbitrary>], iteration_bounds = array<i64: 2, 2>, scalar_prefetch = 0 : i64, scratch_operands = 1 : i64, tpu.core_type = #tpu.core_type<tc>, window_params = [{transform_indices = @transform_0, window_bounds = array<i64: 128, 128>}, {transform_indices = @transform_1, window_bounds = array<i64: 128, 128>}, {transform_indices = @transform_2, window_bounds = array<i64: 128, 128>}]} {
    %c0_i32 = arith.constant 0 : i32
    %0 = arith.cmpi eq, %arg1, %c0_i32 : i32
    %1 = arith.extui %0 : i1 to i32
    %c0_i32_0 = arith.constant 0 : i32
    %2 = arith.cmpi ne, %1, %c0_i32_0 : i32
    scf.if %2 {
      %cst_9 = arith.constant 0.000000e+00 : f32
      %12 = vector.broadcast %cst_9 : f32 to vector<128x128xf32>
      %c0_10 = arith.constant 0 : index
      %c0_11 = arith.constant 0 : index
      %13 = vector.load %arg5[%c0_10, %c0_11] : memref<128x128xf32, #tpu.memory_space<vmem>>, vector<128x128xf32>
      tpu.vector_store %arg5[%c0_10, %c0_11], %12 {strides = array<i32>} : memref<128x128xf32, #tpu.memory_space<vmem>>, vector<128x128xf32>,
    } else {
    }
    %c0 = arith.constant 0 : index
    %c0_1 = arith.constant 0 : index
    %3 = vector.load %arg5[%c0, %c0_1] : memref<128x128xf32, #tpu.memory_space<vmem>>, vector<128x128xf32>
    %c0_2 = arith.constant 0 : index
    %c0_3 = arith.constant 0 : index
    %4 = vector.load %arg2[%c0_2, %c0_3] : memref<128x128xbf16, #tpu.memory_space<vmem>>, vector<128x128xbf16>
    %c0_4 = arith.constant 0 : index
    %c0_5 = arith.constant 0 : index
    %5 = vector.load %arg3[%c0_4, %c0_5] : memref<128x128xbf16, #tpu.memory_space<vmem>>, vector<128x128xbf16>
    %cst = arith.constant dense<0.000000e+00> : vector<128x128xf32>
    %6 = tpu.matmul %4, %5, %cst {dimension_numbers = #tpu.dot_dimension_numbers<[1], [0], [0], [1], [0, 0, 1, 1], [], []>} : vector<128x128xbf16>, vector<128x128xbf16>, vector<128x128xf32> -> vector<128x128xf32>
    %7 = arith.addf %3, %6 : vector<128x128xf32>
    %c0_6 = arith.constant 0 : index
    %c0_7 = arith.constant 0 : index
    %8 = vector.load %arg5[%c0_6, %c0_7] : memref<128x128xf32, #tpu.memory_space<vmem>>, vector<128x128xf32>
    tpu.vector_store %arg5[%c0_6, %c0_7], %7 {strides = array<i32>} : memref<128x128xf32, #tpu.memory_space<vmem>>, vector<128x128xf32>,
    %c1_i32 = arith.constant 1 : i32
    %9 = arith.cmpi eq, %arg1, %c1_i32 : i32
    %10 = arith.extui %9 : i1 to i32
    %c0_i32_8 = arith.constant 0 : i32
    %11 = arith.cmpi ne, %10, %c0_i32_8 : i32
    scf.if %11 {
      %c0_9 = arith.constant 0 : index
      %c0_10 = arith.constant 0 : index
      %12 = vector.load %arg5[%c0_9, %c0_10] : memref<128x128xf32, #tpu.memory_space<vmem>>, vector<128x128xf32>
      %cst_11 = arith.constant 0.000000e+00 : f32
      %13 = vector.broadcast %cst_11 : f32 to vector<128x128xf32>
      %14 = arith.maximumf %12, %13 : vector<128x128xf32>
      %15 = arith.truncf %14 : vector<128x128xf32> to vector<128x128xbf16>
      %c0_12 = arith.constant 0 : index
      %c0_13 = arith.constant 0 : index
      %16 = vector.load %arg4[%c0_12, %c0_13] : memref<128x128xbf16, #tpu.memory_space<vmem>>, vector<128x128xbf16>
      tpu.vector_store %arg4[%c0_12, %c0_13], %15 {strides = array<i32>} : memref<128x128xbf16, #tpu.memory_space<vmem>>, vector<128x128xbf16>,
    } else {
    }
    return
  }
  func.func @transform_0(%arg0: i32, %arg1: i32) -> (i32, i32) {
    %c0_i32 = arith.constant 0 : i32
    return %arg0, %arg1 : i32, i32
  }
  func.func @transform_1(%arg0: i32, %arg1: i32) -> (i32, i32) {
    %c0_i32 = arith.constant 0 : i32
    %c0_i32_0 = arith.constant 0 : i32
    return %arg1, %c0_i32 : i32, i32
  }
  func.func @transform_2(%arg0: i32, %arg1: i32) -> (i32, i32) {
    %c0_i32 = arith.constant 0 : i32
    %c0_i32_0 = arith.constant 0 : i32
    return %arg0, %c0_i32 : i32, i32
  }
}

</mosaic_0001>

<bundles_post_ra>
// kernel: tpu_custom_call.1
= control target key start
LH: loop header
LB: loop body
LE: loop exit
PB: predicated region body
PF: predicated region fallthrough
CT: control target
= control target key end

     0   :  { %s1705_s0 = inlined_call_operand.hbm [shape: bf16[256,256], index: 0, kind: input, shape index: {}]   ;;  %s1706_s1 = inlined_call_operand.hbm [shape: bf16[256,128], index: 1, kind: input, shape index: {}]   ;;  %s1707_s2 = inlined_call_operand.hbm [shape: bf16[256,128], index: 2, kind: output, shape index: {}]  }
   0x1   :  { %1719 = sst [smem:[#allocation17_spill]] %s1705_s0 }
   0x2   :  { %1720 = sst [smem:[#allocation18_spill]] %s1706_s1 }
   0x3   :  { %1721 = sst [smem:[#allocation19_spill]] %s1707_s2 }
   0x4   :  { %7 = vsyncpa [#allocation4], 0 }
   0x5   :  { %9 = vsyncpa [#allocation4 + $0x1], 0 }
   0x6   :  { %10 = vsyncpa [#allocation7], 0 }
   0x7   :  { %12 = vsyncpa [#allocation7 + $0x1], 0 }
   0x8   :  { %13 = vsyncpa [#allocation5], 0 }
   0x9   :  { %15 = vsyncpa [#allocation5 + $0x1], 0  ;;  %s1327_s9 = smov 0   ;;  %s1329_s10 = smov 0  }
   0xa   :  { %s1331_s11 = smov 0   ;;  %s1333_s12 = smov 0  }
   0xb   :  { %s1335_s13 = smov 0   ;;  %s1337_s14 = smov 0  }
   0xc   :  { %s1339_s15 = smov 0   ;;  %s1341_s16 = smov 0  }
   0xd   :  { %s1343_s17 = smov 0   ;;  %s1345_s18 = smov 0  }
   0xe   :  { %s1347_s19 = smov 0   ;;  %s1349_s20 = smov 0  }
   0xf   :  { %s1351_s21 = smov 0   ;;  %s1353_s22 = smov 0  }
  0x10 LB: > { %1722 = sst [smem:[#allocation12_spill]] %s1249_s9  ;;  %s30_s23 = sadd.s32 1, %s1293_s20  ;;  %s1301_s22 = sphi %s1353_s22, %s21_s22   ;;  %s1297_s21 = sphi %s1351_s21, %s1768_s21   ;;  %s1293_s20 = sphi %s1349_s20, %s1767_s20   ;;  %s1289_s19 = sphi %s1347_s19, %s1766_s19   ;;  %s1285_s18 = sphi %s1345_s18, %s1765_s18   ;;  %s1281_s17 = sphi %s1343_s17, %s1764_s17   ;;  %s1277_s16 = sphi %s1341_s16, %s1763_s16   ;;  %s1273_s15 = sphi %s1339_s15, %s1762_s15   ;;  %s1269_s14 = sphi %s1337_s14, %s1761_s14   ;;  %s1265_s13 = sphi %s1335_s13, %s1760_s13   ;;  %s1261_s12 = sphi %s1333_s12, %s1759_s12   ;;  %s1257_s11 = sphi %s1331_s11, %s1758_s11   ;;  %s1253_s10 = sphi %s1329_s10, %s1757_s10   ;;  %s1249_s9 = sphi %s1327_s9, %s1756_s9  }
  0x11   : > { %1723 = sst [smem:[#allocation13_spill]] %s1285_s18  ;;  %s33_s24 = sadd.s32 1, %s1297_s21 }
  0x12   : > { %1724 = sst [smem:[#allocation14_spill]] %s1289_s19  ;;  %p31_p0 = scmp.ge.s32.totalorder %s30_s23, 2 }
  0x13   : > { %s42_s25 = sadd.s32 1, %s1281_s17  ;;  %p49_p1 = scmp.ne.s32.totalorder %s1281_s17, %s1277_s16 }
  0x14   : > { %p1712_p2 = scmp.eq.s32.totalorder %s1301_s22, 0  ;;  %s1770_s23 = smov (%p31_p0, %s30_s23), 0 }
  0x15   : > { %1725 = sst [smem:[#allocation15_spill]] %s1770_s23  ;;  %s1772_s24 = smov (!%p31_p0, %s33_s24), %s1297_s21 }
  0x16   : > { %s1408_s26 = ssub.s32 %s1293_s20, %s1770_s23  ;;  %p1412_p3 = por %p1712_p2, %p49_p1 }
  0x17   : > { %p35_p4 = scmp.ge.s32.totalorder %s1772_s24, 2  ;;  %s94_s28 = sadd.s32 1, %s1257_s11 }
  0x18   : > { %p1711_p7 = scmp.lt.s32.totalorder %s1301_s22, 4  ;;  %s131_s30 = sand.u32 1, %s1281_s17  }
  0x19   : > { %s1774_s24 = smov (%p35_p4, %s1772_s24), 0  ;;  %s758_s6 = sshll.u32 %s131_s30, 6 }
  0x1a   : > { %1727 = sst [smem:[#allocation16_spill]] %s1774_s24  ;;  %s37_s29 = ssub.s32 %s1297_s21, %s1774_s24 }
  0x1b   : > { %s39_s3 = sor.u32 %s1408_s26, %s37_s29  ;;  %p92_p8 = scmp.eq.s32.totalorder %s37_s29, 0 }
  0x1c   : > { %p40_p9 = scmp.eq.s32.totalorder %s39_s3, 0  ;;  %s808_s7 = sshll.u32 %s1297_s21, 5 }
  0x1d   : > { %s1428_s4 = scalar_select %p92_p8, %s1257_s11, %s94_s28  }
  0x1e   : > { %s1431_s5 = scalar_select %p40_p9, %s1281_s17, %s42_s25  }
  0x1f   : > { %s141_s8 = sadd.s32 %s1293_s20, %s808_s7  ;;  %s135_s2 = scalar_lea.vmem [#allocation3], %s758_s6 }
  0x20   : > { %s761_s23 = sshll.u32 %s141_s8, 6  ;;  %s144_s19 = sshll.u32 %s135_s2, 4  ;;  %s1440_s19 = int_to_ptr.vmem [resolvable:$true] %s144_s19 }
  0x21   : > { %s1728_s0 = sld [smem:[#allocation17_spill]]  ;;  %p1446_p10 = pnand %p1711_p7, %p1412_p3 }
  0x22   : > { %p765_p11 = scmp.ge.s32.totalorder %s1301_s22, 1  ;;  %s1451_s2 = scalar_lea.sflag [#allocation4], %s131_s30 }
  0x23   : > { %p1093_p13 = pneg %p1446_p10 }
  0x27   : > { %s1438_s9 = scalar_lea.hbm %s1728_s0, %s761_s23  ;;  %s1096_s27 = scalar_lea.hbm %s1728_s0, 4096 }
  0x28   : > { %s1091_s1 = scalar_lea.hbm %s1438_s9, 1024  ;;  %p1097_p3 = scmp.lt.u32.totalorder %s1438_s9, %s1728_s0 }
  0x29   : > { %p1092_p12 = scmp.ne.s32.totalorder %s1438_s9, %s1091_s1  ;;  %p1098_p4 = scmp.lt.u32.totalorder %s1096_s27, %s1091_s1 }
  0x2a   : > { %p1100_p9 = scmp.lt.u32.totalorder %s1091_s1, %s1438_s9 }
  0x2b   : > { %p1094_p0 = pnand %p1093_p13, %p1092_p12  ;;  %p1099_p8 = por %p1098_p4, %p1097_p3 }
  0x2d   : > { %p1095_p1 = pneg %p1094_p0  ;;  %p1101_p7 = por %p1100_p9, %p1099_p8 }
  0x2f   : > { %p1102_p2 = pnand %p1101_p7, %p1095_p1 }
  0x31   : > { %1105 = shalt.err (!%p1102_p2)
}
  0x32   : > { %s1106_s30 = scalar_lea.vmem %s1440_s19, 1024  ;;  %s1303_s3 = smov [#allocation3]  }
  0x33   : > { %p1107_p12 = scmp.ne.s32.totalorder %s1440_s19, %s1106_s30  ;;  %s1111_s6 = sshll.u32 %s1303_s3, 4  ;;  %s1112_s6 = int_to_ptr.vmem [resolvable:$false] %s1111_s6 }
  0x34   : > { %s1113_s7 = scalar_lea.vmem %s1112_s6, 2048  ;;  %p1114_p6 = scmp.lt.s32.totalorder %s1440_s19, %s1112_s6 }
  0x35   : > { %p1109_p0 = pnand %p1107_p12, %p1093_p13  ;;  %p1115_p3 = scmp.lt.s32.totalorder %s1113_s7, %s1106_s30 }
  0x37   : > { %p1110_p5 = pneg %p1109_p0  ;;  %p1116_p4 = por %p1115_p3, %p1114_p6 }
  0x39   : > { %p1117_p8 = pnand %p1116_p4, %p1110_p5 }
  0x3b   : > { %1120 = shalt.err (!%p1117_p8)
}
  0x3c   : > { %s1304_s8 = smov 128   ;;  %s1713_s1 = smov 64  }
  0x3d   : > { %s1714_s18 = smov 4   ;;  %s1730_s23 = sld [smem:[#allocation12_spill]] }
  0x3e   : > { %947 = dma.hbm_to_vmem [thread:$0]  (!%p1446_p10), %s1438_s9, 1024, %s1440_s19, %s1451_s2, %s1304_s8, %s1713_s1, %s1714_s18  }
  0x3f   : > { %p173_p2 = scmp.lt.s32.totalorder %s1301_s22, 5  ;;  %s754_s28 = sadd.s32 4294967295, %s1301_s22  }
  0x40   : > { %s755_s29 = sadd.s32 4294967294, %s1301_s22   ;;  %p56_p6 = scmp.eq.s32.totalorder %s754_s28, 0 }
  0x41   : > { %p1484_p5 = pnand %p765_p11, %p173_p2  ;;  %s68_s30 = sadd.s32 1, %s1269_s14 }
  0x42   : > { %p1732_p7 = scmp.eq.s32.totalorder %s1408_s26, 0  ;;  %p1733_p13 = scmp.ne.s32.totalorder %s1277_s16, %s1273_s15 }
  0x43   : > { %p75_p10 = scmp.ne.s32.totalorder %s1269_s14, %s1265_s13  ;;  %p81_p11 = scmp.ne.s32.totalorder %s1265_s13, %s1261_s12 }
  0x44   : > { %s1494_s3 = scalar_select %p1732_p7, %s1269_s14, %s68_s30  }
  0x45   : > { %p1499_p1 = por %p56_p6, %p1733_p13  ;;  %p104_p9 = scmp.ne.s32.totalorder %s1257_s11, %s1253_s10 }
  0x46   : > { %p1735_p12 = scmp.eq.s32.totalorder %s1301_s22, 0  ;;  %p105_p3 = scmp.eq.s32.totalorder %s754_s28, 3 }
  0x47   : > { %s1734_s25 = scalar_select %p1499_p1, 1, 0 }
  0x48   : > { %p77_p0 = por %p75_p10, %p1735_p12  ;;  %p1511_p4 = por %p81_p11, %p56_p6 }
  0x49   : > { %p110_p8 = scmp.ne.s32.totalorder %s1253_s10, %s1730_s23  ;;  %p1517_p2 = por %p105_p3, %p104_p9 }
  0x4a   : > { %s1736_s9 = scalar_select %p1511_p4, 1, 0 }
  0x4b   : > { %s1737_s19 = scalar_select %p1517_p2, 1, 0 }
  0x4c   : > { %p111_p7 = scmp.eq.s32.totalorder %s755_s29, 3  ;;  %s154_s15 = sand.u32 1, %s1269_s14  }
  0x4d   : > { %s809_s26 = sshll.u32 %s1293_s20, 10  ;;  %s762_s12 = sshll.u32 %s154_s15, 6 }
  0x4e   : > { %p1523_p13 = por %p111_p7, %p110_p8  ;;  %s1739_s8 = sld [smem:[#allocation18_spill]] }
  0x4f   : > { %p1740_p6 = scmp.lt.s32.totalorder %s1301_s22, 4  ;;  %s158_s29 = scalar_lea.vmem [#allocation6], %s762_s12 }
  0x50   : > { %s1738_s2 = scalar_select %p1523_p13, 1, 0 }
  0x51   : > { %p1534_p10 = pnand %p1740_p6, %p77_p0  ;;  %s165_s30 = sshll.u32 %s158_s29, 4  ;;  %s1538_s30 = int_to_ptr.vmem [resolvable:$true] %s165_s30 }
  0x52   : > { %s1540_s1 = scalar_lea.sflag [#allocation7], %s154_s15 }
  0x53   : > { %p1123_p9 = pneg %p1534_p10 }
  0x54   : > { %s1530_s28 = scalar_lea.hbm %s1739_s8, %s809_s26  ;;  %s1126_s18 = scalar_lea.hbm %s1739_s8, 2048 }
  0x55   : > { %s1121_s6 = scalar_lea.hbm %s1530_s28, 1024  ;;  %p1127_p0 = scmp.lt.u32.totalorder %s1530_s28, %s1739_s8 }
  0x56   : > { %p1122_p11 = scmp.ne.s32.totalorder %s1530_s28, %s1121_s6  ;;  %p1128_p8 = scmp.lt.u32.totalorder %s1126_s18, %s1121_s6 }
  0x57   : > { %p1130_p6 = scmp.lt.u32.totalorder %s1121_s6, %s1530_s28 }
  0x58   : > { %p1124_p12 = pnand %p1123_p9, %p1122_p11  ;;  %p1129_p7 = por %p1128_p8, %p1127_p0 }
  0x5a   : > { %p1125_p3 = pneg %p1124_p12  ;;  %p1131_p13 = por %p1130_p6, %p1129_p7 }
  0x5c   : > { %p1132_p2 = pnand %p1131_p13, %p1125_p3 }
  0x5e   : > { %1135 = shalt.err (!%p1132_p2)
}
  0x5f   : > { %s1136_s15 = scalar_lea.vmem %s1538_s30, 1024  ;;  %s1307_s12 = smov [#allocation6]  }
  0x60   : > { %p1137_p11 = scmp.ne.s32.totalorder %s1538_s30, %s1136_s15  ;;  %s1141_s29 = sshll.u32 %s1307_s12, 4  ;;  %s1142_s29 = int_to_ptr.vmem [resolvable:$false] %s1141_s29 }
  0x61   : > { %s1143_s0 = scalar_lea.vmem %s1142_s29, 2048  ;;  %p1144_p1 = scmp.lt.s32.totalorder %s1538_s30, %s1142_s29 }
  0x62   : > { %p1139_p12 = pnand %p1137_p11, %p1123_p9  ;;  %p1145_p0 = scmp.lt.s32.totalorder %s1143_s0, %s1136_s15 }
  0x64   : > { %p1140_p4 = pneg %p1139_p12  ;;  %p1146_p8 = por %p1145_p0, %p1144_p1 }
  0x66   : > { %p1147_p7 = pnand %p1146_p8, %p1140_p4 }
  0x68   : > { %1150 = shalt.err (!%p1147_p7)
}
  0x69   : > { %s1742_s24 = smov 4   ;;  %s1743_s18 = smov 64  }
  0x6a   : > { %950 = dma.hbm_to_vmem [thread:$0]  (!%p1534_p10), %s1530_s28, 1024, %s1538_s30, %s1540_s1, %s1743_s18, %s1743_s18, %s1742_s24  }
  0x6b   : > { %177 = sbr.rel (%p1484_p5) target bundleno = 435 (0x1b3), region = 28  ;;  %s179_s6 = sand.u32 (!%p1484_p5), 1, %s1277_s16  }
  0x6c   : > { %s766_s26 = sshll.u32 (!%p1484_p5), %s179_s6, 6  ;;  %s180_s7 = scalar_lea.sflag (!%p1484_p5), [#allocation4], %s179_s6 }
  0x6d   : > { %s1574_s15 = scalar_lea.vmem (!%p1484_p5), [#allocation3], %s766_s26  ;;  %p1744_p1 = scmp.ne.s32.totalorder (!%p1484_p5), %s1734_s25, 0 }
  0x72   : > { %1236 = dma.done.wait (%p1744_p1), %s180_s7, 1024  }
  0x73   : > { %1238 = vsyncadd (%p1744_p1), %s180_s7, 4294966272  ;;  %s188_s23 = sand.u32 1, %s1265_s13   ;;  %p1745_p5 = scmp.ne.s32.totalorder %s1736_s9, 0 }
  0x74   : > { %s767_s12 = sshll.u32 %s188_s23, 6  ;;  %s189_s1 = scalar_lea.sflag [#allocation7], %s188_s23 }
  0x75   : > { %s1581_s28 = scalar_lea.vmem [#allocation6], %s767_s12 }
  0x76   : > { %1240 = dma.done.wait (%p1745_p5), %s189_s1, 1024  }
  0x77   : > { %1242 = vsyncadd (%p1745_p5), %s189_s1, 4294966272  ;;  %s215_s27 = sand.u32 1, %s1253_s10   ;;  %s1746_s25 = sld [smem:[#allocation13_spill]] }
  0x78   : > { %s768_s30 = sshll.u32 %s215_s27, 6 }
  0x79   : > { %s1590_s29 = scalar_lea.vmem [#allocation8], %s768_s30 }
  0x7d   : > { %p769_p4 = scmp.ne.s32.totalorder %s1746_s25, 0 }
  0x7e   : > { %v1308_v0 = vmov (!%p769_p4), 0.0  }
  0x7f   : > { %225 = sbr.rel (%p769_p4) target bundleno = 135 (0x87), region = 40  ;;  %226 = vst [vmem:[#allocation2] sm:$0xff] (!%p769_p4), %v1308_v0  ;;  %227 = vst [vmem:[#allocation2 + $0x8] sm:$0xff] (!%p769_p4), %v1308_v0 }
  0x80   : > { %228 = vst [vmem:[#allocation2 + $0x10] sm:$0xff] (!%p769_p4), %v1308_v0  ;;  %229 = vst [vmem:[#allocation2 + $0x18] sm:$0xff] (!%p769_p4), %v1308_v0 }
  0x81   : > { %230 = vst [vmem:[#allocation2 + $0x20] sm:$0xff] (!%p769_p4), %v1308_v0  ;;  %231 = vst [vmem:[#allocation2 + $0x28] sm:$0xff] (!%p769_p4), %v1308_v0 }
  0x82   : > { %232 = vst [vmem:[#allocation2 + $0x30] sm:$0xff] (!%p769_p4), %v1308_v0  ;;  %233 = vst [vmem:[#allocation2 + $0x38] sm:$0xff] (!%p769_p4), %v1308_v0 }
  0x83   : > { %234 = vst [vmem:[#allocation2 + $0x40] sm:$0xff] (!%p769_p4), %v1308_v0  ;;  %235 = vst [vmem:[#allocation2 + $0x48] sm:$0xff] (!%p769_p4), %v1308_v0 }
  0x84   : > { %236 = vst [vmem:[#allocation2 + $0x50] sm:$0xff] (!%p769_p4), %v1308_v0  ;;  %237 = vst [vmem:[#allocation2 + $0x58] sm:$0xff] (!%p769_p4), %v1308_v0 }
  0x85   : > { %238 = vst [vmem:[#allocation2 + $0x60] sm:$0xff] (!%p769_p4), %v1308_v0  ;;  %239 = vst [vmem:[#allocation2 + $0x68] sm:$0xff] (!%p769_p4), %v1308_v0 }
  0x86   : > { %240 = vst [vmem:[#allocation2 + $0x70] sm:$0xff] %v1308_v0  ;;  %241 = vst [vmem:[#allocation2 + $0x78] sm:$0xff] %v1308_v0 }
  0x87 PF: > { %v1075_v1 = vld [vmem:[%s1581_s28] sm:$0xff]   ;;  %v1076_v2 = vld [vmem:[%s1581_s28 + $0x8] sm:$0xff]   ;;  %v1077_v3 = vld [vmem:[%s1581_s28 + $0x10] sm:$0xff]   ;;  %s1747_s9 = sld [smem:[#allocation13_spill]] }
  0x88   : > { %890 = vmatprep.subr.bf16.mxu0 %v1075_v1  ;;  %922 = vmatprep.subr.bf16.mxu1 %v1075_v1  ;;  %v1078_v4 = vld [vmem:[%s1581_s28 + $0x18] sm:$0xff]   ;;  %v1083_v5 = vld [vmem:[%s1574_s15] sm:$0xff]   ;;  %v1080_v8 = vld [vmem:[%s1581_s28 + $0x28] sm:$0xff]  }
  0x89   : > { %891 = vmatpush3.bf16.msra.mxu0 %v1075_v1  ;;  %930 = vmatpush3.bf16.msra.mxu1 %v1075_v1  ;;  %v1084_v6 = vld [vmem:[%s1574_s15 + $0x20] sm:$0xff]   ;;  %v1081_v9 = vld [vmem:[%s1581_s28 + $0x30] sm:$0xff]   ;;  %v1082_v10 = vld [vmem:[%s1581_s28 + $0x38] sm:$0xff]  }
  0x8a   : > { %892 = vmatprep.subr.bf16.mxu0 %v1076_v2  ;;  %923 = vmatprep.subr.bf16.mxu1 %v1076_v2  ;;  %v1079_v7 = vld [vmem:[%s1581_s28 + $0x20] sm:$0xff]   ;;  %v1085_v11 = vld [vmem:[%s1574_s15 + $0x8] sm:$0xff]   ;;  %v1087_v13 = vld [vmem:[%s1574_s15 + $0x10] sm:$0xff]  }
  0x8b   : > { %906 = vmatprep.mubr.bf16.mxu0 %v1083_v5  ;;  %914 = vmatprep.mubr.bf16.mxu1 %v1084_v6  ;;  %v1086_v12 = vld [vmem:[%s1574_s15 + $0x28] sm:$0xff]   ;;  %v1088_v14 = vld [vmem:[%s1574_s15 + $0x30] sm:$0xff]   ;;  %v1089_v15 = vld [vmem:[%s1574_s15 + $0x18] sm:$0xff]  }
  0x8c   : > { %v1090_v16 = vld [vmem:[%s1574_s15 + $0x38] sm:$0xff]   ;;  %v244_v17 = vld [vmem:[#allocation2 + $0x10] sm:$0xff]  ;;  %v242_v19 = vld [vmem:[#allocation2] sm:$0xff] }
  0x8d   : > { %893 = vmatpush3.bf16.msra.mxu0 %v1076_v2  ;;  %931 = vmatpush3.bf16.msra.mxu1 %v1076_v2  ;;  %v252_v18 = vld [vmem:[#allocation2 + $0x50] sm:$0xff]  ;;  %v250_v20 = vld [vmem:[#allocation2 + $0x40] sm:$0xff]  ;;  %v245_v23 = vld [vmem:[#allocation2 + $0x18] sm:$0xff]  ;;  %p786_p2 = scmp.ne.s32.totalorder %s1747_s9, 1 }
  0x8e   : > { %894 = vmatprep.subr.bf16.mxu0 %v1077_v3  ;;  %924 = vmatprep.subr.bf16.mxu1 %v1077_v3  ;;  %v253_v24 = vld [vmem:[#allocation2 + $0x58] sm:$0xff]  ;;  %v243_v29 = vld [vmem:[#allocation2 + $0x8] sm:$0xff]  ;;  %v248_v41 = vld [vmem:[#allocation2 + $0x30] sm:$0xff] }
  0x8f   : > { %v251_v30 = vld [vmem:[#allocation2 + $0x48] sm:$0xff]  ;;  %v256_v42 = vld [vmem:[#allocation2 + $0x70] sm:$0xff]  ;;  %v246_v43 = vld [vmem:[#allocation2 + $0x20] sm:$0xff] }
  0x90   : > { %v254_v44 = vld [vmem:[#allocation2 + $0x60] sm:$0xff]  ;;  %v249_v47 = vld [vmem:[#allocation2 + $0x38] sm:$0xff]  ;;  %v247_v53 = vld [vmem:[#allocation2 + $0x28] sm:$0xff] }
  0x91   : > { %895 = vmatpush3.bf16.msra.mxu0 %v1077_v3  ;;  %932 = vmatpush3.bf16.msra.mxu1 %v1077_v3  ;;  %v257_v48 = vld [vmem:[#allocation2 + $0x78] sm:$0xff]  ;;  %v255_v54 = vld [vmem:[#allocation2 + $0x68] sm:$0xff] }
  0x92   : > { %896 = vmatprep.subr.bf16.mxu0 %v1078_v4  ;;  %925 = vmatprep.subr.bf16.mxu1 %v1078_v4 }
  0x95   : > { %897 = vmatpush3.bf16.msra.mxu0 %v1078_v4  ;;  %933 = vmatpush3.bf16.msra.mxu1 %v1078_v4 }
  0x96   : > { %898 = vmatprep.subr.bf16.mxu0 %v1079_v7  ;;  %926 = vmatprep.subr.bf16.mxu1 %v1079_v7 }
  0x99   : > { %899 = vmatpush3.bf16.msra.mxu0 %v1079_v7  ;;  %934 = vmatpush3.bf16.msra.mxu1 %v1079_v7 }
  0x9a   : > { %900 = vmatprep.subr.bf16.mxu0 %v1080_v8  ;;  %927 = vmatprep.subr.bf16.mxu1 %v1080_v8 }
  0x9d   : > { %901 = vmatpush3.bf16.msra.mxu0 %v1080_v8  ;;  %935 = vmatpush3.bf16.msra.mxu1 %v1080_v8 }
  0x9e   : > { %902 = vmatprep.subr.bf16.mxu0 %v1081_v9  ;;  %928 = vmatprep.subr.bf16.mxu1 %v1081_v9 }
  0xa1   : > { %903 = vmatpush3.bf16.msra.mxu0 %v1081_v9  ;;  %936 = vmatpush3.bf16.msra.mxu1 %v1081_v9 }
  0xa2   : > { %904 = vmatprep.subr.bf16.mxu0 %v1082_v10  ;;  %929 = vmatprep.subr.bf16.mxu1 %v1082_v10 }
  0xa5   : > { %905 = vmatpush3.bf16.msra.mxu0 %v1082_v10  ;;  %937 = vmatpush3.bf16.msra.mxu1 %v1082_v10 }
  0xa8   : > { %907 = vmatmul.mubr.bf16.vlgmr.msra.gmra.mrb[0].mxu0 %v1085_v11  ;;  %915 = vmatmul.mubr.bf16.vlgmr.msra.gmra.mrb[0].mxu1 %v1086_v12 }
  0xa9   : > { %910 = vmatprep.mubr.bf16.mxu0 %v1087_v13  ;;  %918 = vmatprep.mubr.bf16.mxu1 %v1088_v14 }
  0xb0   : > { %911 = vmatmul.mubr.bf16.gmra.mrb[4].mxu0 %v1089_v15  ;;  %919 = vmatmul.mubr.bf16.gmra.mrb[4].mxu1 %v1090_v16 }
 0x17b   : > { %v908_v21 = vpop.f32.mrb[0].mxu0  ;;  %v916_v22 = vpop.f32.mrb[0].mxu1 }
 0x17c   : > { %v485_v25 = vadd.f32 %v908_v21, %v244_v17  ;;  %v493_v26 = vadd.f32 %v916_v22, %v252_v18  ;;  %v420_v27 = vpop.f32.mrb[1].mxu0  ;;  %v452_v28 = vpop.f32.mrb[1].mxu1 }
 0x17d   : > { %v483_v31 = vadd.f32 %v420_v27, %v242_v19  ;;  %v491_v32 = vadd.f32 %v452_v28, %v250_v20  ;;  %v909_v33 = vpop.f32.mrb[2].mxu0  ;;  %v917_v34 = vpop.f32.mrb[2].mxu1 }
 0x17e   : > { %501 = vst [vmem:[#allocation2 + $0x10] sm:$0xff] %v485_v25  ;;  %509 = vst [vmem:[#allocation2 + $0x50] sm:$0xff] %v493_v26  ;;  %v486_v35 = vadd.f32 %v909_v33, %v245_v23  ;;  %v494_v36 = vadd.f32 %v917_v34, %v253_v24  ;;  %v423_v37 = vpop.f32.mrb[3].mxu0  ;;  %v455_v38 = vpop.f32.mrb[3].mxu1 }
 0x17f   : > { %499 = vst [vmem:[#allocation2] sm:$0xff] %v483_v31  ;;  %507 = vst [vmem:[#allocation2 + $0x40] sm:$0xff] %v491_v32  ;;  %v484_v39 = vadd.f32 %v423_v37, %v243_v29  ;;  %v492_v40 = vadd.f32 %v455_v38, %v251_v30 }
 0x180   : > { %502 = vst [vmem:[#allocation2 + $0x18] sm:$0xff] %v486_v35  ;;  %510 = vst [vmem:[#allocation2 + $0x58] sm:$0xff] %v494_v36 }
 0x181   : > { %500 = vst [vmem:[#allocation2 + $0x8] sm:$0xff] %v484_v39  ;;  %508 = vst [vmem:[#allocation2 + $0x48] sm:$0xff] %v492_v40 }
 0x183   : > { %v912_v45 = vpop.f32.mrb[4].mxu0  ;;  %v920_v46 = vpop.f32.mrb[4].mxu1  ;;  %518 = sbr.rel (%p786_p2) target bundleno = 407 (0x197), region = 44 }
 0x184   : > { %v489_v49 = vadd.f32 %v912_v45, %v248_v41  ;;  %v497_v50 = vadd.f32 %v920_v46, %v256_v42  ;;  %v436_v51 = vpop.f32.mrb[5].mxu0  ;;  %v468_v52 = vpop.f32.mrb[5].mxu1 }
 0x185   : > { %v487_v55 = vadd.f32 %v436_v51, %v246_v43  ;;  %v495_v56 = vadd.f32 %v468_v52, %v254_v44  ;;  %v913_v57 = vpop.f32.mrb[6].mxu0  ;;  %v921_v58 = vpop.f32.mrb[6].mxu1  ;;  %v521_v3 = vld [vmem:[#allocation2 + $0x10] sm:$0xff] (!%p786_p2) }
 0x186   : > { %505 = vst [vmem:[#allocation2 + $0x30] sm:$0xff] %v489_v49  ;;  %513 = vst [vmem:[#allocation2 + $0x70] sm:$0xff] %v497_v50  ;;  %v490_v59 = vadd.f32 %v913_v57, %v249_v47  ;;  %v498_v60 = vadd.f32 %v921_v58, %v257_v48  ;;  %v439_v61 = vpop.f32.mrb[7].mxu0  ;;  %v471_v62 = vpop.f32.mrb[7].mxu1  ;;  %v519_v1 = vld [vmem:[#allocation2] sm:$0xff] (!%p786_p2)  ;;  %v537_v7 = vmax.f32 (!%p786_p2), %v521_v3, 0.0 }
 0x187   : > { %503 = vst [vmem:[#allocation2 + $0x20] sm:$0xff] %v487_v55  ;;  %511 = vst [vmem:[#allocation2 + $0x60] sm:$0xff] %v495_v56  ;;  %v488_v63 = vadd.f32 %v439_v61, %v247_v53  ;;  %v496_v0 = vadd.f32 %v471_v62, %v255_v54  ;;  %v535_v4 = vmax.f32 (!%p786_p2), %v519_v1, 0.0  ;;  %v522_v6 = vld [vmem:[#allocation2 + $0x18] sm:$0xff] (!%p786_p2)  ;;  %v527_v15 = vld [vmem:[#allocation2 + $0x40] sm:$0xff] (!%p786_p2) }
 0x188   : > { %506 = vst [vmem:[#allocation2 + $0x38] sm:$0xff] %v490_v59  ;;  %514 = vst [vmem:[#allocation2 + $0x78] sm:$0xff] %v498_v60  ;;  %v520_v2 = vld [vmem:[#allocation2 + $0x8] sm:$0xff] (!%p786_p2)  ;;  %v538_v10 = vmax.f32 (!%p786_p2), %v522_v6, 0.0  ;;  %v543_v20 = vmax.f32 (!%p786_p2), %v527_v15, 0.0  ;;  %v529_v21 = vld [vmem:[#allocation2 + $0x50] sm:$0xff] (!%p786_p2) }
 0x189   : > { %504 = vst [vmem:[#allocation2 + $0x28] sm:$0xff] %v488_v63  ;;  %512 = vst [vmem:[#allocation2 + $0x68] sm:$0xff] %v496_v0  ;;  %v536_v5 = vmax.f32 (!%p786_p2), %v520_v2, 0.0  ;;  %v528_v19 = vld [vmem:[#allocation2 + $0x48] sm:$0xff] (!%p786_p2)  ;;  %v530_v22 = vld [vmem:[#allocation2 + $0x58] sm:$0xff] (!%p786_p2)  ;;  %v545_v26 = vmax.f32 (!%p786_p2), %v529_v21, 0.0 }
 0x18a   : > { %v835_v23 = vpack.c.bf16 %v538_v10, %v537_v7  ;;  %v544_v25 = vmax.f32 %v528_v19, 0.0  ;;  %v546_v31 = vmax.f32 %v530_v22, 0.0 }
 0x18b   : > { %v830_v16 = vpack.c.bf16 %v536_v5, %v535_v4 }
 0x18c   : > { %867 = vst [vmem:[%s1590_s29 + $0x8] sm:$0xff] %v835_v23   ;;  %v850_v35 = vpack.c.bf16 %v544_v25, %v543_v20  ;;  %v855_v38 = vpack.c.bf16 %v546_v31, %v545_v26 }
 0x18d   : > { %v525_v13 = vld [vmem:[#allocation2 + $0x30] sm:$0xff]  ;;  %831 = vst [vmem:[%s1590_s29] sm:$0xff] %v830_v16  }
 0x18e   : > { %v523_v8 = vld [vmem:[#allocation2 + $0x20] sm:$0xff]  ;;  %v541_v17 = vmax.f32 %v525_v13, 0.0  ;;  %v533_v29 = vld [vmem:[#allocation2 + $0x70] sm:$0xff]  ;;  %870 = vst [vmem:[%s1590_s29 + $0x20] sm:$0xff] %v850_v35   ;;  %871 = vst [vmem:[%s1590_s29 + $0x28] sm:$0xff] %v855_v38  }
 0x18f   : > { %v539_v11 = vmax.f32 %v523_v8, 0.0  ;;  %v526_v14 = vld [vmem:[#allocation2 + $0x38] sm:$0xff]  ;;  %v531_v27 = vld [vmem:[#allocation2 + $0x60] sm:$0xff]  ;;  %v549_v36 = vmax.f32 %v533_v29, 0.0 }
 0x190   : > { %v524_v9 = vld [vmem:[#allocation2 + $0x28] sm:$0xff]  ;;  %v542_v18 = vmax.f32 %v526_v14, 0.0  ;;  %v547_v32 = vmax.f32 %v531_v27, 0.0  ;;  %v534_v34 = vld [vmem:[#allocation2 + $0x78] sm:$0xff] }
 0x191   : > { %v540_v12 = vmax.f32 %v524_v9, 0.0  ;;  %v532_v28 = vld [vmem:[#allocation2 + $0x68] sm:$0xff]  ;;  %v550_v37 = vmax.f32 %v534_v34, 0.0 }
 0x192   : > { %v845_v30 = vpack.c.bf16 %v542_v18, %v541_v17  ;;  %v548_v33 = vmax.f32 %v532_v28, 0.0 }
 0x193   : > { %v840_v24 = vpack.c.bf16 %v540_v12, %v539_v11  ;;  %v865_v40 = vpack.c.bf16 %v550_v37, %v549_v36 }
 0x194   : > { %869 = vst [vmem:[%s1590_s29 + $0x18] sm:$0xff] %v845_v30   ;;  %v860_v39 = vpack.c.bf16 %v548_v33, %v547_v32 }
 0x195   : > { %868 = vst [vmem:[%s1590_s29 + $0x10] sm:$0xff] %v840_v24   ;;  %873 = vst [vmem:[%s1590_s29 + $0x38] sm:$0xff] %v865_v40  }
 0x196   : > { %872 = vst [vmem:[%s1590_s29 + $0x30] sm:$0xff] %v860_v39  }
 0x197 PF: > { %s1748_s0 = sld [smem:[#allocation14_spill]]  ;;  %s1749_s26 = sld [smem:[#allocation19_spill]] }
 0x198   : > { %s645_s15 = sshll.u32 %s1590_s29, 4  ;;  %s1629_s23 = scalar_lea.sflag [#allocation5], %s215_s27  ;;  %s1625_s15 = int_to_ptr.vmem [resolvable:$true] %s645_s15 }
 0x199   : > { %s1151_s12 = scalar_lea.vmem %s1625_s15, 1024  ;;  %p1750_p10 = scmp.ne.s32.totalorder %s1737_s19, 0 }
 0x19a   : > { %p1152_p13 = scmp.ne.s32.totalorder %s1625_s15, %s1151_s12  ;;  %s1309_s1 = smov [#allocation8]  }
 0x19b   : > { %s1155_s28 = sshll.u32 %s1309_s1, 4  ;;  %s1156_s28 = int_to_ptr.vmem [resolvable:$false] %s1155_s28 }
 0x19c   : > { %p1153_p9 = pnand %p1152_p13, %p1750_p10  ;;  %s1157_s30 = scalar_lea.vmem %s1156_s28, 2048 }
 0x19d   : > { %s826_s24 = sshll.u32 %s1748_s0, 10  ;;  %p1158_p6 = scmp.lt.s32.totalorder %s1625_s15, %s1156_s28 }
 0x19e   : > { %s1622_s7 = scalar_lea.hbm %s1749_s26, %s826_s24  ;;  %p1154_p3 = pneg %p1153_p9 }
 0x19f   : > { %p1159_p11 = scmp.lt.s32.totalorder %s1157_s30, %s1151_s12 }
 0x1a1   : > { %p1160_p12 = por %p1159_p11, %p1158_p6 }
 0x1a3   : > { %p1161_p0 = pnand %p1160_p12, %p1154_p3 }
 0x1a5   : > { %1164 = shalt.err (!%p1161_p0)
}
 0x1a6   : > { %s1165_s27 = scalar_lea.hbm %s1622_s7, 1024  ;;  %s1169_s9 = scalar_lea.hbm %s1749_s26, 2048 }
 0x1a7   : > { %p1166_p8 = scmp.ne.s32.totalorder %s1622_s7, %s1165_s27  ;;  %p1170_p5 = scmp.lt.u32.totalorder %s1622_s7, %s1749_s26 }
 0x1a8   : > { %p1171_p4 = scmp.lt.u32.totalorder %s1169_s9, %s1165_s27  ;;  %p1173_p13 = scmp.lt.u32.totalorder %s1165_s27, %s1622_s7 }
 0x1a9   : > { %p1167_p7 = pnand %p1166_p8, %p1750_p10 }
 0x1aa   : > { %p1172_p2 = por %p1171_p4, %p1170_p5 }
 0x1ab   : > { %p1168_p1 = pneg %p1167_p7 }
 0x1ac   : > { %p1174_p9 = por %p1173_p13, %p1172_p2 }
 0x1ae   : > { %p1175_p3 = pnand %p1174_p9, %p1168_p1 }
 0x1b0   : > { %1178 = shalt.err (!%p1175_p3)
}
 0x1b1   : > { %s1310_s18 = smov 64   ;;  %s1311_s6 = smov 4  }
 0x1b2   : > { %942 = dma.vmem_to_hbm [thread:$0]  (%p1750_p10), %s1625_s15, 1024, %s1622_s7, %s1629_s23, %s1310_s18, %s1310_s18, %s1311_s6  }
 0x1b3 PF: > { %s1751_s12 = sld [smem:[#allocation12_spill]]  ;;  %p956_p6 = scmp.ge.s32.totalorder %s1301_s22, 2 }
 0x1b4   : > { %p1752_p11 = scmp.ne.s32.totalorder %s1738_s2, 0 }
 0x1b6   : > { %p952_p12 = pnand %p956_p6, %p1752_p11 }
 0x1b9   : > { %s660_s1 = sand.u32 1, %s1751_s12  }
 0x1ba   : > { %s661_s28 = scalar_lea.sflag [#allocation5], %s660_s1 }
 0x1bb   : > { %1244 = dma.done.wait (!%p952_p12), %s661_s28, 1024  }
 0x1bc   : > { %1246 = vsyncadd (!%p952_p12), %s661_s28, 4294966272  ;;  %s21_s22 = sadd.s32 1, %s1301_s22   ;;  %s1754_s2 = sld [smem:[#allocation15_spill]] }
 0x1bd   : > { %p1658_p0 = scmp.ge.s32.totalorder %s21_s22, 6   ;;  %s1755_s7 = sld [smem:[#allocation16_spill]] }
 0x1be   : > { %s1756_s9 = smov %s1253_s10  ;;  %s1757_s10 = smov %s1257_s11 }
 0x1bf   : > { %s1758_s11 = smov %s1428_s4  ;;  %s1759_s12 = smov %s1265_s13 }
 0x1c0   : > { %s1760_s13 = smov %s1269_s14  ;;  %s1761_s14 = smov %s1494_s3 }
 0x1c1   : > { %s1762_s15 = smov %s1277_s16  ;;  %s1763_s16 = smov %s1281_s17 }
 0x1c2   : > { %s1764_s17 = smov %s1431_s5  ;;  %s1765_s18 = smov %s1293_s20 }
 0x1c3   : > { %s1766_s19 = smov %s1297_s21  ;;  %s1767_s20 = smov %s1754_s2 }
 0x1c4   : > { %s1768_s21 = smov %s1755_s7  ;;  %20 = sbr.rel (!%p1658_p0) target bundleno = 16 (0x10), region = 94 }
 0x1cb   :  { %666 = vsyncpa [#allocation4], 1 }
 0x1cc   :  { %668 = vsyncpa [#allocation4 + $0x1], 1 }
 0x1cd   :  { %669 = vsyncpa [#allocation7], 1 }
 0x1ce   :  { %671 = vsyncpa [#allocation7 + $0x1], 1 }
 0x1cf   :  { %672 = vsyncpa [#allocation5], 1 }
 0x1d0   :  { %674 = vsyncpa [#allocation5 + $0x1], 1 }

</bundles_post_ra>
